<compile_context>
chip_gen: v7x
topology: tpu7x:2x2x1
jax: 0.10.0
libtpu: 0.0.40
codegen_flags: <defaults>
</compile_context>

<pallas_src>
import jax
import jax.numpy as jnp
from jax import lax
from jax.experimental import pallas as pl
from jax.experimental.pallas import tpu as pltpu

# Logical (PyTorch) dims
D_IN = 300   # input_length
D_H = 150    # fc1 / fc3 hidden width
D_Z = 64     # latent width
# Lane-padded internal dims (multiples of 128)
D_H_P = 256
D_Z_P = 128  # fused [mu | logvar] slab width (64 + 64)


def _round_up(n, m):
    return ((n + m - 1) // m) * m


def _choose_tb(B, max_tb=512):
    """Pick a batch tile: sublane multiple, small last-tile waste, >=2 grid
    steps when the batch is big enough (v7x dual-TensorCore)."""
    Bp8 = _round_up(max(B, 1), 8)
    if Bp8 >= 16:
        max_tb = min(max_tb, max(8, _round_up(Bp8 // 2, 8)))
    else:
        max_tb = min(max_tb, Bp8)
    for t in (512, 256, 128, 64, 32, 16, 8):
        if t <= max_tb:
            waste = _round_up(Bp8, t) - Bp8
            if waste * 4 <= Bp8 or t == 8:   # <=25% padded rows
                return t
    return 8


def vae_forward_kernel(x_ref, eps_ref,
                       w1_ref, b1_ref,
                       w2_ref, b2_ref,
                       w3_ref, b3_ref,
                       w4_ref, b4_ref,
                       recon_ref, mlv_ref):
    x = x_ref[...].astype(jnp.bfloat16)                               # (TB, 300)

    # encode: h1 = relu(x @ W1 + b1) -> (TB, 256); cols >= 150 stay exactly 0
    h1 = jnp.dot(x, w1_ref[...], preferred_element_type=jnp.float32) + b1_ref[...]
    h1 = jnp.maximum(h1, 0.0)

    # fused head: [mu | logvar] = h1 @ [W21|W22] + [b21|b22] -> (TB, 128)
    mlv = jnp.dot(h1.astype(jnp.bfloat16), w2_ref[...],
                  preferred_element_type=jnp.float32) + b2_ref[...]
    mlv_ref[...] = mlv

    # reparametrize on the full 128-lane slab (no 64-lane slices):
    #   roll puts logvar into lanes [0,64); lanes [64,128) would see mu, which
    #   is masked to 0 before exp so the dead lanes stay finite.  eps lanes
    #   [64,128) are zero-padded, so z lanes [64,128) = logvar (finite) and are
    #   annihilated by the zero rows 64..127 of w3.
    lv_sh = pltpu.roll(mlv, shift=D_Z, axis=1)
    lane = lax.broadcasted_iota(jnp.int32, mlv.shape, 1)
    lv_sh = jnp.where(lane < D_Z, lv_sh, 0.0)
    z_slab = eps_ref[...] * jnp.exp(0.5 * lv_sh) + mlv                # (TB, 128)

    # decode: h3 = relu(z @ W3 + b3) ; recon = sigmoid(h3 @ W4 + b4)
    h3 = jnp.dot(z_slab.astype(jnp.bfloat16), w3_ref[...],
                 preferred_element_type=jnp.float32) + b3_ref[...]
    h3 = jnp.maximum(h3, 0.0)
    logits = jnp.dot(h3.astype(jnp.bfloat16), w4_ref[...],
                     preferred_element_type=jnp.float32) + b4_ref[...]
    recon_ref[...] = jax.nn.sigmoid(logits)


def pack_params(params):
    """Fuse fc21|fc22, zero-pad internal dims to lane multiples, cast the
    weight slabs to bf16 (biases stay f32)."""
    w1, b1, w21, b21, w22, b22, w3, b3, w4, b4 = params
    f32, bf16 = jnp.float32, jnp.bfloat16
    w1p = jnp.zeros((D_IN, D_H_P), f32).at[:, :D_H].set(w1).astype(bf16)       # (300,256)
    b1p = jnp.zeros((1, D_H_P), f32).at[:, :D_H].set(b1)
    w2p = (jnp.zeros((D_H_P, D_Z_P), f32)
           .at[:D_H, :D_Z].set(w21)
           .at[:D_H, D_Z:].set(w22)).astype(bf16)                              # (256,128)
    b2p = jnp.concatenate([b21, b22], axis=1).astype(f32)                      # (1,128)
    w3p = jnp.zeros((D_Z_P, D_H_P), f32).at[:D_Z, :D_H].set(w3).astype(bf16)   # (128,256)
    b3p = jnp.zeros((1, D_H_P), f32).at[:, :D_H].set(b3)
    w4p = jnp.zeros((D_H_P, D_IN), f32).at[:D_H, :].set(w4).astype(bf16)       # (256,300)
    b4p = b4.astype(f32)                                                       # (1,300)
    return (w1p, b1p, w2p, b2p, w3p, b3p, w4p, b4p)


def vae_forward(x, eps, packed, tb=None):
    """x: (B, 300) f32, eps: (B, 64) f32, packed: output of pack_params().
    Returns (recon (B,300), mu (B,64), logvar (B,64))."""
    B = x.shape[0]
    if tb is None:
        tb = _choose_tb(B)
    Bp = _round_up(B, tb)
    grid = (Bp // tb,)

    # x keeps its natural 300-lane width (no lane padding / no extra HBM pass);
    # only the batch axis is padded, and only to the tile size.
    x_in = x if Bp == B else jnp.pad(x, ((0, Bp - B), (0, 0)))
    # eps gets 64 zero lanes appended (tiny) so the kernel works on a 128 slab.
    eps_in = jnp.pad(eps, ((0, Bp - B), (0, D_Z_P - D_Z)))

    def batch_spec(width):
        return pl.BlockSpec((tb, width), lambda i: (i, 0))

    def resident(arr):
        # constant block index -> DMA'd once, stays VMEM-resident across grid
        return pl.BlockSpec(arr.shape, lambda i: (0, 0))

    w1p, b1p, w2p, b2p, w3p, b3p, w4p, b4p = packed
    in_specs = [
        batch_spec(D_IN),                       # x  (tb, 300)
        batch_spec(D_Z_P),                      # eps (tb, 128)
        resident(w1p), resident(b1p),
        resident(w2p), resident(b2p),
        resident(w3p), resident(b3p),
        resident(w4p), resident(b4p),
    ]
    out_specs = (batch_spec(D_IN), batch_spec(D_Z_P))
    out_shape = (jax.ShapeDtypeStruct((Bp, D_IN), jnp.float32),
                 jax.ShapeDtypeStruct((Bp, D_Z_P), jnp.float32))

    recon_p, mlv = pl.pallas_call(
        vae_forward_kernel,
        grid=grid,
        in_specs=in_specs,
        out_specs=out_specs,
        out_shape=out_shape,
        compiler_params=pltpu.CompilerParams(
            dimension_semantics=("parallel",),
            vmem_limit_bytes=48 * 1024 * 1024),
    )(x_in, eps_in, *packed)

    recon = recon_p if Bp == B else recon_p[:B]
    mu = mlv[:B, :D_Z]
    logvar = mlv[:B, D_Z:]
    return recon, mu, logvar


def init_params(key):
    """Deterministic param init mirroring nn.Linear shapes (stored as (in, out))."""
    dims = [
        ("fc1", 300, 150),
        ("fc21", 150, 64),
        ("fc22", 150, 64),
        ("fc3", 64, 150),
        ("fc4", 150, 300),
    ]
    params = []
    for i, (_, d_in, d_out) in enumerate(dims):
        kw, kb = jax.random.split(jax.random.fold_in(key, i))
        bound = 1.0 / jnp.sqrt(d_in)
        w = jax.random.uniform(kw, (d_in, d_out), jnp.float32, -bound, bound)
        b = jax.random.uniform(kb, (1, d_out), jnp.float32, -bound, bound)
        params += [w, b]
    return params


def reference_forward(x, eps, params):
    (w1, b1, w21, b21, w22, b22, w3, b3, w4, b4) = params
    h1 = jnp.maximum(x @ w1 + b1, 0.0)
    mu = h1 @ w21 + b21
    logvar = h1 @ w22 + b22
    z = eps * jnp.exp(0.5 * logvar) + mu
    h3 = jnp.maximum(z @ w3 + b3, 0.0)
    recon = jax.nn.sigmoid(h3 @ w4 + b4)
    return recon, mu, logvar


if __name__ == "__main__":
    key = jax.random.PRNGKey(0)
    k_x, k_eps, k_p = jax.random.split(key, 3)

    B = 2
    x = jax.random.normal(k_x, (B, D_IN), jnp.float32)
    # TODO(synk): torch draws eps via FloatTensor.normal_() at runtime; here eps
    # is drawn deterministically in JAX and passed into the kernel.
    eps = jax.random.normal(k_eps, (B, D_Z), jnp.float32)
    params = init_params(k_p)
    packed = pack_params(params)

    recon, mu, logvar = vae_forward(x, eps, packed)
    jax.block_until_ready((recon, mu, logvar))

    r_ref, m_ref, lv_ref = reference_forward(x, eps, params)
    assert recon.shape == (B, D_IN) and mu.shape == (B, D_Z) and logvar.shape == (B, D_Z)
    # bf16 matmul operands (f32 accumulation) -> relaxed tolerance vs f32 reference
    assert jnp.allclose(recon, r_ref, atol=2e-2, rtol=2e-2)
    assert jnp.allclose(mu, m_ref, atol=2e-2, rtol=2e-2)
    assert jnp.allclose(logvar, lv_ref, atol=2e-2, rtol=2e-2)

    print("KERNEL_OK")
</pallas_src>

<mosaic_0001>
module attributes {stable_mosaic.version = 11 : i64} {
  func.func @vae_forward_kernel(%arg0: i32, %arg1: memref<8x300xf32, #tpu.memory_space<vmem>>, %arg2: memref<8x128xf32, #tpu.memory_space<vmem>>, %arg3: memref<300x256xbf16, #tpu.memory_space<vmem>>, %arg4: memref<1x256xf32, #tpu.memory_space<vmem>>, %arg5: memref<256x128xbf16, #tpu.memory_space<vmem>>, %arg6: memref<1x128xf32, #tpu.memory_space<vmem>>, %arg7: memref<128x256xbf16, #tpu.memory_space<vmem>>, %arg8: memref<1x256xf32, #tpu.memory_space<vmem>>, %arg9: memref<256x300xbf16, #tpu.memory_space<vmem>>, %arg10: memref<1x300xf32, #tpu.memory_space<vmem>>, %arg11: memref<8x300xf32, #tpu.memory_space<vmem>>, %arg12: memref<8x128xf32, #tpu.memory_space<vmem>>) attributes {dimension_semantics = [#tpu.dimension_semantics<parallel>], iteration_bounds = array<i64: 1>, scalar_prefetch = 0 : i64, scratch_operands = 0 : i64, tpu.core_type = #tpu.core_type<tc>, window_params = [{transform_indices = @transform_0, window_bounds = array<i64: 8, 300>}, {transform_indices = @transform_1, window_bounds = array<i64: 8, 128>}, {pipeline_mode = #tpu.pipeline_mode<synchronous>, transform_indices = @transform_2, window_bounds = array<i64: 300, 256>}, {pipeline_mode = #tpu.pipeline_mode<synchronous>, transform_indices = @transform_3, window_bounds = array<i64: 1, 256>}, {pipeline_mode = #tpu.pipeline_mode<synchronous>, transform_indices = @transform_4, window_bounds = array<i64: 256, 128>}, {pipeline_mode = #tpu.pipeline_mode<synchronous>, transform_indices = @transform_5, window_bounds = array<i64: 1, 128>}, {pipeline_mode = #tpu.pipeline_mode<synchronous>, transform_indices = @transform_6, window_bounds = array<i64: 128, 256>}, {pipeline_mode = #tpu.pipeline_mode<synchronous>, transform_indices = @transform_7, window_bounds = array<i64: 1, 256>}, {pipeline_mode = #tpu.pipeline_mode<synchronous>, transform_indices = @transform_8, window_bounds = array<i64: 256, 300>}, {pipeline_mode = #tpu.pipeline_mode<synchronous>, transform_indices = @transform_9, window_bounds = array<i64: 1, 300>}, {transform_indices = @transform_10, window_bounds = array<i64: 8, 300>}, {transform_indices = @transform_11, window_bounds = array<i64: 8, 128>}]} {
    %c0 = arith.constant 0 : index
    %c0_0 = arith.constant 0 : index
    %0 = vector.load %arg1[%c0, %c0_0] : memref<8x300xf32, #tpu.memory_space<vmem>>, vector<8x300xf32>
    %1 = arith.truncf %0 : vector<8x300xf32> to vector<8x300xbf16>
    %c0_1 = arith.constant 0 : index
    %c0_2 = arith.constant 0 : index
    %2 = vector.load %arg3[%c0_1, %c0_2] : memref<300x256xbf16, #tpu.memory_space<vmem>>, vector<300x256xbf16>
    %cst = arith.constant dense<0.000000e+00> : vector<8x256xf32>
    %3 = tpu.matmul %1, %2, %cst {dimension_numbers = #tpu.dot_dimension_numbers<[1], [0], [0], [1], [0, 0, 1, 1], [], []>} : vector<8x300xbf16>, vector<300x256xbf16>, vector<8x256xf32> -> vector<8x256xf32>
    %c0_3 = arith.constant 0 : index
    %c0_4 = arith.constant 0 : index
    %4 = vector.load %arg4[%c0_3, %c0_4] : memref<1x256xf32, #tpu.memory_space<vmem>>, vector<1x256xf32>
    %5 = vector.broadcast %4 : vector<1x256xf32> to vector<8x256xf32>
    %6 = arith.addf %3, %5 : vector<8x256xf32>
    %cst_5 = arith.constant 0.000000e+00 : f32
    %7 = vector.broadcast %cst_5 : f32 to vector<8x256xf32>
    %8 = arith.maximumf %6, %7 : vector<8x256xf32>
    %9 = arith.truncf %8 : vector<8x256xf32> to vector<8x256xbf16>
    %c0_6 = arith.constant 0 : index
    %c0_7 = arith.constant 0 : index
    %10 = vector.load %arg5[%c0_6, %c0_7] : memref<256x128xbf16, #tpu.memory_space<vmem>>, vector<256x128xbf16>
    %cst_8 = arith.constant dense<0.000000e+00> : vector<8x128xf32>
    %11 = tpu.matmul %9, %10, %cst_8 {dimension_numbers = #tpu.dot_dimension_numbers<[1], [0], [0], [1], [0, 0, 1, 1], [], []>} : vector<8x256xbf16>, vector<256x128xbf16>, vector<8x128xf32> -> vector<8x128xf32>
    %c0_9 = arith.constant 0 : index
    %c0_10 = arith.constant 0 : index
    %12 = vector.load %arg6[%c0_9, %c0_10] : memref<1x128xf32, #tpu.memory_space<vmem>>, vector<1x128xf32>
    %13 = vector.broadcast %12 : vector<1x128xf32> to vector<8x128xf32>
    %14 = arith.addf %11, %13 : vector<8x128xf32>
    %c0_11 = arith.constant 0 : index
    %c0_12 = arith.constant 0 : index
    %15 = vector.load %arg12[%c0_11, %c0_12] : memref<8x128xf32, #tpu.memory_space<vmem>>, vector<8x128xf32>
    tpu.vector_store %arg12[%c0_11, %c0_12], %14 {strides = array<i32>} : memref<8x128xf32, #tpu.memory_space<vmem>>, vector<8x128xf32>,
    %c64_i32 = arith.constant 64 : i32
    %16 = tpu.dynamic_rotate %14 by %c64_i32 dim 1 : vector<8x128xf32>, i32 -> vector<8x128xf32>
    %17 = tpu.iota {dimensions = array<i32: 1>} : vector<8x128xi32>
    %c64_i32_13 = arith.constant 64 : i32
    %18 = vector.broadcast %c64_i32_13 : i32 to vector<8x128xi32>
    %19 = arith.cmpi slt, %17, %18 : vector<8x128xi32>
    %cst_14 = arith.constant 0.000000e+00 : f32
    %20 = vector.broadcast %cst_14 : f32 to vector<8x128xf32>
    %21 = arith.select %19, %16, %20 : vector<8x128xi1>, vector<8x128xf32>
    %c0_15 = arith.constant 0 : index
    %c0_16 = arith.constant 0 : index
    %22 = vector.load %arg2[%c0_15, %c0_16] : memref<8x128xf32, #tpu.memory_space<vmem>>, vector<8x128xf32>
    %cst_17 = arith.constant 5.000000e-01 : f32
    %23 = vector.broadcast %cst_17 : f32 to vector<8x128xf32>
    %24 = arith.mulf %23, %21 : vector<8x128xf32>
    %25 = math.exp %24 : vector<8x128xf32>
    %26 = arith.mulf %22, %25 : vector<8x128xf32>
    %27 = arith.addf %26, %14 : vector<8x128xf32>
    %28 = arith.truncf %27 : vector<8x128xf32> to vector<8x128xbf16>
    %c0_18 = arith.constant 0 : index
    %c0_19 = arith.constant 0 : index
    %29 = vector.load %arg7[%c0_18, %c0_19] : memref<128x256xbf16, #tpu.memory_space<vmem>>, vector<128x256xbf16>
    %cst_20 = arith.constant dense<0.000000e+00> : vector<8x256xf32>
    %30 = tpu.matmul %28, %29, %cst_20 {dimension_numbers = #tpu.dot_dimension_numbers<[1], [0], [0], [1], [0, 0, 1, 1], [], []>} : vector<8x128xbf16>, vector<128x256xbf16>, vector<8x256xf32> -> vector<8x256xf32>
    %c0_21 = arith.constant 0 : index
    %c0_22 = arith.constant 0 : index
    %31 = vector.load %arg8[%c0_21, %c0_22] : memref<1x256xf32, #tpu.memory_space<vmem>>, vector<1x256xf32>
    %32 = vector.broadcast %31 : vector<1x256xf32> to vector<8x256xf32>
    %33 = arith.addf %30, %32 : vector<8x256xf32>
    %cst_23 = arith.constant 0.000000e+00 : f32
    %34 = vector.broadcast %cst_23 : f32 to vector<8x256xf32>
    %35 = arith.maximumf %33, %34 : vector<8x256xf32>
    %36 = arith.truncf %35 : vector<8x256xf32> to vector<8x256xbf16>
    %c0_24 = arith.constant 0 : index
    %c0_25 = arith.constant 0 : index
    %37 = vector.load %arg9[%c0_24, %c0_25] : memref<256x300xbf16, #tpu.memory_space<vmem>>, vector<256x300xbf16>
    %cst_26 = arith.constant dense<0.000000e+00> : vector<8x300xf32>
    %38 = tpu.matmul %36, %37, %cst_26 {dimension_numbers = #tpu.dot_dimension_numbers<[1], [0], [0], [1], [0, 0, 1, 1], [], []>} : vector<8x256xbf16>, vector<256x300xbf16>, vector<8x300xf32> -> vector<8x300xf32>
    %c0_27 = arith.constant 0 : index
    %c0_28 = arith.constant 0 : index
    %39 = vector.load %arg10[%c0_27, %c0_28] : memref<1x300xf32, #tpu.memory_space<vmem>>, vector<1x300xf32>
    %40 = vector.broadcast %39 : vector<1x300xf32> to vector<8x300xf32>
    %41 = arith.addf %38, %40 : vector<8x300xf32>
    %42 = arith.negf %41 : vector<8x300xf32>
    %43 = math.exp %42 : vector<8x300xf32>
    %cst_29 = arith.constant 1.000000e+00 : f32
    %44 = vector.broadcast %cst_29 : f32 to vector<8x300xf32>
    %45 = arith.addf %44, %43 : vector<8x300xf32>
    %46 = arith.divf %44, %45 : vector<8x300xf32>
    %c0_30 = arith.constant 0 : index
    %c0_31 = arith.constant 0 : index
    %47 = vector.load %arg11[%c0_30, %c0_31] : memref<8x300xf32, #tpu.memory_space<vmem>>, vector<8x300xf32>
    tpu.vector_store %arg11[%c0_30, %c0_31], %46 {strides = array<i32>} : memref<8x300xf32, #tpu.memory_space<vmem>>, vector<8x300xf32>,
    return
  }
  func.func @transform_0(%arg0: i32) -> (i32, i32) {
    %c0_i32 = arith.constant 0 : i32
    %c0_i32_0 = arith.constant 0 : i32
    return %arg0, %c0_i32 : i32, i32
  }
  func.func @transform_1(%arg0: i32) -> (i32, i32) {
    %c0_i32 = arith.constant 0 : i32
    %c0_i32_0 = arith.constant 0 : i32
    return %arg0, %c0_i32 : i32, i32
  }
  func.func @transform_2(%arg0: i32) -> (i32, i32) {
    %c0_i32 = arith.constant 0 : i32
    %c0_i32_0 = arith.constant 0 : i32
    %c0_i32_1 = arith.constant 0 : i32
    return %c0_i32, %c0_i32_0 : i32, i32
  }
  func.func @transform_3(%arg0: i32) -> (i32, i32) {
    %c0_i32 = arith.constant 0 : i32
    %c0_i32_0 = arith.constant 0 : i32
    %c0_i32_1 = arith.constant 0 : i32
    return %c0_i32, %c0_i32_0 : i32, i32
  }
  func.func @transform_4(%arg0: i32) -> (i32, i32) {
    %c0_i32 = arith.constant 0 : i32
    %c0_i32_0 = arith.constant 0 : i32
    %c0_i32_1 = arith.constant 0 : i32
    return %c0_i32, %c0_i32_0 : i32, i32
  }
  func.func @transform_5(%arg0: i32) -> (i32, i32) {
    %c0_i32 = arith.constant 0 : i32
    %c0_i32_0 = arith.constant 0 : i32
    %c0_i32_1 = arith.constant 0 : i32
    return %c0_i32, %c0_i32_0 : i32, i32
  }
  func.func @transform_6(%arg0: i32) -> (i32, i32) {
    %c0_i32 = arith.constant 0 : i32
    %c0_i32_0 = arith.constant 0 : i32
    %c0_i32_1 = arith.constant 0 : i32
    return %c0_i32, %c0_i32_0 : i32, i32
  }
  func.func @transform_7(%arg0: i32) -> (i32, i32) {
    %c0_i32 = arith.constant 0 : i32
    %c0_i32_0 = arith.constant 0 : i32
    %c0_i32_1 = arith.constant 0 : i32
    return %c0_i32, %c0_i32_0 : i32, i32
  }
  func.func @transform_8(%arg0: i32) -> (i32, i32) {
    %c0_i32 = arith.constant 0 : i32
    %c0_i32_0 = arith.constant 0 : i32
    %c0_i32_1 = arith.constant 0 : i32
    return %c0_i32, %c0_i32_0 : i32, i32
  }
  func.func @transform_9(%arg0: i32) -> (i32, i32) {
    %c0_i32 = arith.constant 0 : i32
    %c0_i32_0 = arith.constant 0 : i32
    %c0_i32_1 = arith.constant 0 : i32
    return %c0_i32, %c0_i32_0 : i32, i32
  }
  func.func @transform_10(%arg0: i32) -> (i32, i32) {
    %c0_i32 = arith.constant 0 : i32
    %c0_i32_0 = arith.constant 0 : i32
    return %arg0, %c0_i32 : i32, i32
  }
  func.func @transform_11(%arg0: i32) -> (i32, i32) {
    %c0_i32 = arith.constant 0 : i32
    %c0_i32_0 = arith.constant 0 : i32
    return %arg0, %c0_i32 : i32, i32
  }
}

</mosaic_0001>

<bundles_post_ra>
// kernel: tpu_custom_call.1
= control target key start
LH: loop header
LB: loop body
LE: loop exit
PB: predicated region body
PF: predicated region fallthrough
CT: control target
= control target key end

     0   :  { %17 = vsyncpa [#allocation3], 0  ;;  %v1591_v53 = vmov 0   ;;  %s2076_s0 = inlined_call_operand.vmem [shape: f32[8,300], index: 0, kind: input, shape index: {}]   ;;  %s2077_s1 = inlined_call_operand.vmem [shape: f32[8,128], index: 1, kind: input, shape index: {}]   ;;  %s2078_s2 = inlined_call_operand.vmem [shape: bf16[300,256], index: 2, kind: input, shape index: {}]   ;;  %s2079_s3 = inlined_call_operand.vmem [shape: f32[1,256], index: 3, kind: input, shape index: {}]   ;;  %s2080_s4 = inlined_call_operand.vmem [shape: bf16[256,128], index: 4, kind: input, shape index: {}]   ;;  %s2081_s5 = inlined_call_operand.vmem [shape: f32[1,128], index: 5, kind: input, shape index: {}]   ;;  %s2082_s6 = inlined_call_operand.vmem [shape: bf16[128,256], index: 6, kind: input, shape index: {}]   ;;  %s2083_s7 = inlined_call_operand.vmem [shape: f32[1,256], index: 7, kind: input, shape index: {}]   ;;  %s2084_s8 = inlined_call_operand.vmem [shape: bf16[256,300], index: 8, kind: input, shape index: {}]   ;;  %s2085_s9 = inlined_call_operand.vmem [shape: f32[1,300], index: 9, kind: input, shape index: {}]   ;;  %s2086_s10 = inlined_call_operand.hbm [shape: f32[8,300], index: 10, kind: output, shape index: {0}]   ;;  %s2087_s11 = inlined_call_operand.hbm [shape: f32[8,128], index: 11, kind: output, shape index: {1}]  }
   0x1   :  { %v1368_v0 = vld [vmem:[%s2078_s2 + $0x4] ss:$8 sps:$4 sm:$0xff]   ;;  %v1370_v1 = vld [vmem:[%s2078_s2] ss:$8 sps:$4 sm:$0xff]   ;;  %v1371_v2 = vld [vmem:[%s2078_s2 + $0x14] ss:$8 sps:$4 sm:$0xff]  }
   0x2   :  { %295 = vmatprep.subr.bf16.mxu0 %v1368_v0  ;;  %v1373_v3 = vld [vmem:[%s2078_s2 + $0x10] ss:$8 sps:$4 sm:$0xff]   ;;  %v1374_v4 = vld [vmem:[%s2078_s2 + $0x24] ss:$8 sps:$4 sm:$0xff]   ;;  %v1376_v5 = vld [vmem:[%s2078_s2 + $0x20] ss:$8 sps:$4 sm:$0xff]  }
   0x3   :  { %296 = vmatpush1.bf16.msra.mxu0 %v1370_v1  ;;  %v1377_v6 = vld [vmem:[%s2078_s2 + $0x34] ss:$8 sps:$4 sm:$0xff]   ;;  %v1379_v7 = vld [vmem:[%s2078_s2 + $0x30] ss:$8 sps:$4 sm:$0xff]   ;;  %v1380_v8 = vld [vmem:[%s2078_s2 + $0x44] ss:$8 sps:$4 sm:$0xff]  }
   0x4   :  { %297 = vmatprep.subr.bf16.mxu0 %v1371_v2  ;;  %v1382_v9 = vld [vmem:[%s2078_s2 + $0x40] ss:$8 sps:$4 sm:$0xff]   ;;  %v1383_v10 = vld [vmem:[%s2078_s2 + $0x54] ss:$8 sps:$4 sm:$0xff]   ;;  %v1385_v11 = vld [vmem:[%s2078_s2 + $0x50] ss:$8 sps:$4 sm:$0xff]  }
   0x5   :  { %v1386_v12 = vld [vmem:[%s2078_s2 + $0x64] ss:$8 sps:$4 sm:$0xff]   ;;  %v1388_v15 = vld [vmem:[%s2078_s2 + $0x60] ss:$8 sps:$4 sm:$0xff]   ;;  %v1389_v16 = vld [vmem:[%s2078_s2 + $0x74] ss:$8 sps:$4 sm:$0xff]  }
   0x6   :  { %v41_v13 = vld [vmem:[%s2076_s0 + $0x8] sm:$0xff]  ;;  %v1391_v17 = vld [vmem:[%s2078_s2 + $0x70] ss:$8 sps:$4 sm:$0xff]   ;;  %v1425_v19 = vld [vmem:[%s2080_s4 + $0x40] sm:$0xff]  }
   0x7   :  { %298 = vmatpush1.bf16.msra.mxu0 %v1373_v3  ;;  %v44_v14 = vpack.c.bf16 %v41_v13, %v41_v13  ;;  %v1392_v18 = vld [vmem:[%s2078_s2 + $0x84] ss:$8 sps:$4 sm:$0xff]   ;;  %1314 = vmatprep.subr.bf16.mxu1 %v1425_v19  ;;  %v1394_v21 = vld [vmem:[%s2078_s2 + $0x80] ss:$8 sps:$4 sm:$0xff]   ;;  %v1429_v24 = vld [vmem:[%s2080_s4 + $0x50] sm:$0xff]  }
   0x8   :  { %299 = vmatprep.subr.bf16.mxu0 %v1374_v4  ;;  %v1426_v20 = vld [vmem:[%s2080_s4] sm:$0xff]   ;;  %v1427_v22 = vld [vmem:[%s2080_s4 + $0x48] sm:$0xff]   ;;  %v1395_v25 = vld [vmem:[%s2078_s2 + $0x94] ss:$8 sps:$4 sm:$0xff]  }
   0x9   :  { %327 = vmatprep.mubr.bf16.mxu0 %v44_v14  ;;  %1315 = vmatpush3.bf16.msra.mxu1 %v1426_v20  ;;  %v1428_v23 = vld [vmem:[%s2080_s4 + $0x8] sm:$0xff]   ;;  %v1397_v26 = vld [vmem:[%s2078_s2 + $0x90] ss:$8 sps:$4 sm:$0xff]   ;;  %v1401_v31 = vld [vmem:[%s2078_s2 + $0xb4] ss:$8 sps:$4 sm:$0xff]  }
   0xa   :  { %1316 = vmatprep.subr.bf16.mxu1 %v1427_v22  ;;  %v1430_v27 = vld [vmem:[%s2080_s4 + $0x10] sm:$0xff]   ;;  %v1431_v28 = vld [vmem:[%s2080_s4 + $0x58] sm:$0xff]   ;;  %v1398_v29 = vld [vmem:[%s2078_s2 + $0xa4] ss:$8 sps:$4 sm:$0xff]  }
   0xb   :  { %300 = vmatpush1.bf16.msra.mxu0 %v1376_v5  ;;  %v1400_v30 = vld [vmem:[%s2078_s2 + $0xa0] ss:$8 sps:$4 sm:$0xff]   ;;  %v1432_v32 = vld [vmem:[%s2080_s4 + $0x18] sm:$0xff]   ;;  %v1404_v37 = vld [vmem:[%s2078_s2 + $0xc4] ss:$8 sps:$4 sm:$0xff]  }
   0xc   :  { %301 = vmatprep.subr.bf16.mxu0 %v1377_v6  ;;  %v1433_v33 = vld [vmem:[%s2080_s4 + $0x60] sm:$0xff]   ;;  %v1403_v35 = vld [vmem:[%s2078_s2 + $0xb0] ss:$8 sps:$4 sm:$0xff]   ;;  %v1435_v36 = vld [vmem:[%s2080_s4 + $0x68] sm:$0xff]  }
   0xd   :  { %1317 = vmatpush3.bf16.msra.mxu1 %v1428_v23  ;;  %v1434_v34 = vld [vmem:[%s2080_s4 + $0x20] sm:$0xff]   ;;  %v1436_v38 = vld [vmem:[%s2080_s4 + $0x28] sm:$0xff]   ;;  %v1407_v40 = vld [vmem:[%s2078_s2 + $0xd4] ss:$8 sps:$4 sm:$0xff]  }
   0xe   :  { %1318 = vmatprep.subr.bf16.mxu1 %v1429_v24  ;;  %v1406_v39 = vld [vmem:[%s2078_s2 + $0xc0] ss:$8 sps:$4 sm:$0xff]   ;;  %v1409_v41 = vld [vmem:[%s2078_s2 + $0xd0] ss:$8 sps:$4 sm:$0xff]   ;;  %v1410_v42 = vld [vmem:[%s2078_s2 + $0xe4] ss:$8 sps:$4 sm:$0xff]  }
   0xf   :  { %302 = vmatpush1.bf16.msra.mxu0 %v1379_v7  ;;  %v1412_v43 = vld [vmem:[%s2078_s2 + $0xe0] ss:$8 sps:$4 sm:$0xff]   ;;  %v1413_v44 = vld [vmem:[%s2078_s2 + $0xf4] ss:$8 sps:$4 sm:$0xff]   ;;  %v1415_v45 = vld [vmem:[%s2078_s2 + $0xf0] ss:$8 sps:$4 sm:$0xff]  }
  0x10   :  { %303 = vmatprep.subr.bf16.mxu0 %v1380_v8  ;;  %v40_v46 = vld [vmem:[%s2076_s0] sm:$0xff]  ;;  %v1421_v50 = vld [vmem:[%s2078_s2 + $0x114] ss:$8 sps:$4 sm:$0xff]   ;;  %v1419_v51 = vld [vmem:[%s2078_s2 + $0x110] ss:$8 sps:$4 sm:$0xff]  }
  0x11   :  { %1319 = vmatpush3.bf16.msra.mxu1 %v1430_v27  ;;  %v1418_v47 = vld [vmem:[%s2078_s2 + $0x104] ss:$8 sps:$4 sm:$0xff]   ;;  %v1416_v48 = vld [vmem:[%s2078_s2 + $0x100] ss:$8 sps:$4 sm:$0xff]   ;;  %v43_v49 = vpack.c.bf16 %v40_v46, %v40_v46 }
  0x12   :  { %1320 = vmatprep.subr.bf16.mxu1 %v1431_v28  ;;  %v1422_v52 = vld [vmem:[%s2078_s2 + $0x124] ss:$8 sps:$4 sm:$0x3f]   ;;  %v1424_v54 = vld [vmem:[%s2078_s2 + $0x120] ss:$8 sps:$4 sm:$0x3f]  }
  0x13   :  { %304 = vmatpush1.bf16.msra.mxu0 %v1382_v9 }
  0x14   :  { %305 = vmatprep.subr.bf16.mxu0 %v1383_v10 }
  0x15   :  { %1321 = vmatpush3.bf16.msra.mxu1 %v1432_v32 }
  0x16   :  { %1322 = vmatprep.subr.bf16.mxu1 %v1433_v33 }
  0x17   :  { %306 = vmatpush1.bf16.msra.mxu0 %v1385_v11 }
  0x18   :  { %307 = vmatprep.subr.bf16.mxu0 %v1386_v12 }
  0x19   :  { %1323 = vmatpush3.bf16.msra.mxu1 %v1434_v34 }
  0x1a   :  { %1324 = vmatprep.subr.bf16.mxu1 %v1435_v36 }
  0x1b   :  { %308 = vmatpush1.bf16.msra.mxu0 %v1388_v15 }
  0x1c   :  { %309 = vmatprep.subr.bf16.mxu0 %v1389_v16 }
  0x1d   :  { %1325 = vmatpush3.bf16.msra.mxu1 %v1436_v38 }
  0x1f   :  { %310 = vmatpush1.bf16.msra.mxu0 %v1391_v17 }
  0x20   :  { %311 = vmatprep.subr.bf16.mxu0 %v1392_v18 }
  0x23   :  { %312 = vmatpush1.bf16.msra.mxu0 %v1394_v21 }
  0x24   :  { %313 = vmatprep.subr.bf16.mxu0 %v1395_v25 }
  0x27   :  { %314 = vmatpush1.bf16.msra.mxu0 %v1397_v26 }
  0x28   :  { %315 = vmatprep.subr.bf16.mxu0 %v1398_v29 }
  0x2b   :  { %316 = vmatpush1.bf16.msra.mxu0 %v1400_v30 }
  0x2c   :  { %317 = vmatprep.subr.bf16.mxu0 %v1401_v31 }
  0x2f   :  { %318 = vmatpush1.bf16.msra.mxu0 %v1403_v35 }
  0x30   :  { %319 = vmatprep.subr.bf16.mxu0 %v1404_v37 }
  0x33   :  { %320 = vmatpush1.bf16.msra.mxu0 %v1406_v39 }
  0x34   :  { %321 = vmatprep.subr.bf16.mxu0 %v1407_v40 }
  0x37   :  { %322 = vmatpush1.bf16.msra.mxu0 %v1409_v41 }
  0x38   :  { %323 = vmatprep.subr.bf16.mxu0 %v1410_v42 }
  0x3b   :  { %324 = vmatpush1.bf16.msra.mxu0 %v1412_v43 }
  0x3c   :  { %325 = vmatprep.subr.bf16.mxu0 %v1413_v44 }
  0x3f   :  { %326 = vmatpush1.bf16.msra.mxu0 %v1415_v45 }
  0x40   :  { %336 = vmatprep.subr.bf16.mxu0 %v1418_v47 }
  0x42   :  { %328 = vmatmul.mubr.bf16.vlgmr.msra.gmra.mrb[0].mxu0 %v43_v49 }
  0x43   :  { %337 = vmatpush1.bf16.msra.mxu0 %v1416_v48  ;;  %368 = vmatprep.mubr.bf16.mxu0 %v1591_v53 }
  0x44   :  { %338 = vmatprep.subr.bf16.mxu0 %v1421_v50 }
  0x45   :  { %18 = vsyncpa [#allocation5], 0  ;;  %vm288_vm0 = vcmask 1045504   ;;  %v42_v55 = vld [vmem:[%s2076_s0 + $0x10] sm:$0xff]  ;;  %vm284_vm1 = vcmask 359424   ;;  %v1439_v60 = vld [vmem:[%s2080_s4 + $0x78] sm:$0xff]   ;;  %v86_v62 = vlaneseq }
  0x46   :  { %v290_v56 = vsel %vm288_vm0, %v1424_v54, 0  ;;  %v45_v57 = vpack.c.bf16 %v42_v55, %v42_v55  ;;  %v1437_v58 = vld [vmem:[%s2080_s4 + $0x70] sm:$0xff]   ;;  %v1440_v61 = vld [vmem:[%s2080_s4 + $0x38] sm:$0xff]   ;;  %v84_v1 = vld [vmem:[%s2079_s3] sm:$0x3] }
  0x47   :  { %339 = vmatpush1.bf16.msra.mxu0 %v1419_v51  ;;  %v1438_v59 = vld [vmem:[%s2080_s4 + $0x30] sm:$0xff]   ;;  %1326 = vmatprep.subr.bf16.mxu1 %v1437_v58  ;;  %v1828_v63 = vshrl.u32 %v86_v62, 7  ;;  %v1441_v15 = vld [vmem:[%s2082_s6] ss:$8 sps:$4 sm:$0xff]   ;;  %v1443_v16 = vld [vmem:[%s2082_s6 + $0x4] ss:$8 sps:$4 sm:$0xff]  }
  0x48   :  { %1228 = vmatprep.subr.msk.bf16.mxu0 %vm288_vm0, %v1422_v52  ;;  %1327 = vmatpush3.bf16.msra.mxu1 %v1438_v59  ;;  %v1446_v17 = vld [vmem:[%s2082_s6 + $0x14] ss:$8 sps:$4 sm:$0xff]   ;;  %v1444_v18 = vld [vmem:[%s2082_s6 + $0x10] ss:$8 sps:$4 sm:$0xff]   ;;  %v1449_v19 = vld [vmem:[%s2082_s6 + $0x24] ss:$8 sps:$4 sm:$0xff]  }
  0x49   :  { %1328 = vmatprep.subr.bf16.mxu1 %v1439_v60  ;;  %v1831_v0 = vsub.s32 0, %v1828_v63  ;;  %v1837_v2 = vsub.s32 1, %v1828_v63  ;;  %v1447_v20 = vld [vmem:[%s2082_s6 + $0x20] ss:$8 sps:$4 sm:$0xff]   ;;  %v1452_v21 = vld [vmem:[%s2082_s6 + $0x34] ss:$8 sps:$4 sm:$0xff]  }
  0x4a   :  { %v1450_v22 = vld [vmem:[%s2082_s6 + $0x30] ss:$8 sps:$4 sm:$0xff]   ;;  %v1455_v23 = vld [vmem:[%s2082_s6 + $0x44] ss:$8 sps:$4 sm:$0xff]   ;;  %v1453_v24 = vld [vmem:[%s2082_s6 + $0x40] ss:$8 sps:$4 sm:$0xff]  }
  0x4b   :  { %341 = vmatpush1.bf16.msra.mxu0 %v290_v56  ;;  %v89_v3 = vrot.slane %v84_v1, %v1831_v0  ;;  %v93_v4 = vrot.slane %v84_v1, %v1837_v2  ;;  %v1458_v25 = vld [vmem:[%s2082_s6 + $0x54] ss:$8 sps:$4 sm:$0xff]   ;;  %v1456_v27 = vld [vmem:[%s2082_s6 + $0x50] ss:$8 sps:$4 sm:$0xff]   ;;  %v1230_v28 = vld [vmem:[%s2081_s5] ss:$0 sm:$0xff] }
  0x4c   :  { %1329 = vmatpush3.bf16.msra.mxu1 %v1440_v61  ;;  %v1461_v30 = vld [vmem:[%s2082_s6 + $0x64] ss:$8 sps:$4 sm:$0xff]   ;;  %v1459_v35 = vld [vmem:[%s2082_s6 + $0x60] ss:$8 sps:$4 sm:$0xff]   ;;  %v1464_v36 = vld [vmem:[%s2082_s6 + $0x74] ss:$8 sps:$4 sm:$0xff]  }
  0x4d   :  { %678 = vmatprep.subr.bf16.mxu1 %v1443_v16  ;;  %s1592_s5 = smov 64   ;;  %v1462_v37 = vld [vmem:[%s2082_s6 + $0x70] ss:$8 sps:$4 sm:$0xff]   ;;  %v1492_v39 = vld [vmem:[%s2084_s8 + $0xc8] ss:$12 sps:$4 sm:$0xff]   ;;  %v560_v51 = vand.u32 127, %v86_v62 }
  0x4e   :  { %1229 = vmatmul.mubr.msk.bf16.vlgmr.msra.gmra.mrb[0].mxu0 %vm284_vm1, %v45_v57  ;;  %v1467_v38 = vld [vmem:[%s2084_s8 + $0x4] ss:$12 sps:$4 sm:$0xff]   ;;  %1336 = vmatprep.subr.bf16.mxu0 %v1492_v39  ;;  %v1493_v40 = vld [vmem:[%s2084_s8 + $0x8] ss:$12 sps:$4 sm:$0xff]   ;;  %v1497_v41 = vld [vmem:[%s2084_s8 + $0xe0] ss:$12 sps:$4 sm:$0xff]  }
  0x4f   :  { %1337 = vmatpush3.bf16.msra.mxu0 %v1493_v40  ;;  %v1498_v42 = vld [vmem:[%s2084_s8 + $0x20] ss:$12 sps:$4 sm:$0xff]   ;;  %v1502_v43 = vld [vmem:[%s2084_s8 + $0xf8] ss:$12 sps:$4 sm:$0xff]   ;;  %v1507_v45 = vld [vmem:[%s2084_s8 + $0x110] ss:$12 sps:$4 sm:$0xff]  }
  0x50   :  { %1338 = vmatprep.subr.bf16.mxu0 %v1497_v41  ;;  %v1503_v44 = vld [vmem:[%s2084_s8 + $0x38] ss:$12 sps:$4 sm:$0xff]   ;;  %v1508_v46 = vld [vmem:[%s2084_s8 + $0x50] ss:$12 sps:$4 sm:$0xff]   ;;  %v1512_v47 = vld [vmem:[%s2084_s8 + $0x128] ss:$12 sps:$4 sm:$0xff]  }
  0x51   :  { %v1513_v48 = vld [vmem:[%s2084_s8 + $0x68] ss:$12 sps:$4 sm:$0xff]   ;;  %v1517_v49 = vld [vmem:[%s2084_s8 + $0x140] ss:$12 sps:$4 sm:$0xff]   ;;  %vm561_vm2 = vcmp.lt.s32.totalorder %v560_v51, 64 }
  0x52   :  { %v1518_v50 = vld [vmem:[%s2084_s8 + $0x80] ss:$12 sps:$4 sm:$0xff]   ;;  %v1470_v62 = vld [vmem:[%s2084_s8 + $0x1c] ss:$12 sps:$4 sm:$0xff]   ;;  %v1468_v1 = vld [vmem:[%s2084_s8 + $0x18] ss:$12 sps:$4 sm:$0xff]  }
  0x53   :  { %1339 = vmatpush3.bf16.msra.mxu0 %v1498_v42  ;;  %v563_v56 = vld [vmem:[%s2077_s1] sm:$0xff] }
  0x54   :  { %1340 = vmatprep.subr.bf16.mxu0 %v1502_v43  ;;  %v1465_v60 = vld [vmem:[%s2084_s8] ss:$12 sps:$4 sm:$0xff]  }
  0x55   :  { %v1489_v16 = vld [vmem:[%s2084_s8 + $0xc0] ss:$12 sps:$4 sm:$0xff]  }
  0x57   :  { %1341 = vmatpush3.bf16.msra.mxu0 %v1503_v44 }
  0x58   :  { %1342 = vmatprep.subr.bf16.mxu0 %v1507_v45 }
  0x5b   :  { %1343 = vmatpush3.bf16.msra.mxu0 %v1508_v46 }
  0x5c   :  { %1344 = vmatprep.subr.bf16.mxu0 %v1512_v47 }
  0x5f   :  { %1345 = vmatpush3.bf16.msra.mxu0 %v1513_v48 }
  0x60   :  { %1346 = vmatprep.subr.bf16.mxu0 %v1517_v49 }
  0x63   :  { %1347 = vmatpush3.bf16.msra.mxu0 %v1518_v50 }
 0x121   :  { %v370_v5 = vpop.f32.mrb[0].mxu0 }
 0x122   :  { %v1358_v6 = vadd.f32 %v370_v5, %v89_v3  ;;  %v372_v7 = vpop.f32.mrb[1].mxu0  ;;  %v1473_v3 = vld [vmem:[%s2084_s8 + $0x34] ss:$12 sps:$4 sm:$0xff]   ;;  %v1476_v5 = vld [vmem:[%s2084_s8 + $0x4c] ss:$12 sps:$4 sm:$0xff]  }
 0x123   :  { %v1359_v8 = vadd.f32 %v372_v7, %v93_v4  ;;  %v374_v9 = vpop.f32.mrb[2].mxu0  ;;  %v1471_v4 = vld [vmem:[%s2084_s8 + $0x30] ss:$12 sps:$4 sm:$0xff]  }
 0x124   :  { %v377_v10 = vmax.f32 %v1358_v6, 0.0  ;;  %v375_v11 = vpop.f32.mrb[3].mxu0  ;;  %v1474_v6 = vld [vmem:[%s2084_s8 + $0x48] ss:$12 sps:$4 sm:$0xff]   ;;  %v1479_v7 = vld [vmem:[%s2084_s8 + $0x64] ss:$12 sps:$4 sm:$0xff]  }
 0x125   :  { %v378_v12 = vmax.f32 %v1359_v8, 0.0  ;;  %v1477_v8 = vld [vmem:[%s2084_s8 + $0x60] ss:$12 sps:$4 sm:$0xff]   ;;  %v1482_v9 = vld [vmem:[%s2084_s8 + $0x7c] ss:$12 sps:$4 sm:$0xff]  }
 0x126   :  { %v379_v14 = vpack.c.bf16 %v377_v10, %v377_v10  ;;  %v1480_v10 = vld [vmem:[%s2084_s8 + $0x78] ss:$12 sps:$4 sm:$0xff]   ;;  %v1485_v11 = vld [vmem:[%s2084_s8 + $0x94] ss:$12 sps:$4 sm:$0xff]  }
 0x127   :  { %v380_v13 = vpack.c.bf16 %v378_v12, %v378_v12  ;;  %v1483_v12 = vld [vmem:[%s2084_s8 + $0x90] ss:$12 sps:$4 sm:$0xff]  }
 0x129   :  { %548 = vmatprep.mubr.bf16.mxu1 %v380_v13  ;;  %v1488_v13 = vld [vmem:[%s2084_s8 + $0xac] ss:$12 sps:$4 sm:$0xff]  }
 0x12a   :  { %549 = vmatmul.mubr.bf16.vlgmr.msra.gmra.mrb[0].mxu1 %v379_v14  ;;  %v1486_v14 = vld [vmem:[%s2084_s8 + $0xa8] ss:$12 sps:$4 sm:$0xff]  }
 0x12b   :  { %710 = vmatprep.mubr.bf16.mxu1 %v1591_v53  ;;  %679 = vmatpush1.bf16.msra.mxu1 %v1441_v15  ;;  %v1491_v15 = vld [vmem:[%s2084_s8 + $0xc4] ss:$12 sps:$4 sm:$0xff]  }
 0x12c   :  { %680 = vmatprep.subr.bf16.mxu1 %v1446_v17  ;;  %v1496_v17 = vld [vmem:[%s2084_s8 + $0xdc] ss:$12 sps:$4 sm:$0xff]  }
 0x12f   :  { %681 = vmatpush1.bf16.msra.mxu1 %v1444_v18  ;;  %v1494_v18 = vld [vmem:[%s2084_s8 + $0xd8] ss:$12 sps:$4 sm:$0xff]  }
 0x130   :  { %682 = vmatprep.subr.bf16.mxu1 %v1449_v19  ;;  %v1501_v19 = vld [vmem:[%s2084_s8 + $0xf4] ss:$12 sps:$4 sm:$0xff]  }
 0x133   :  { %683 = vmatpush1.bf16.msra.mxu1 %v1447_v20  ;;  %v1499_v20 = vld [vmem:[%s2084_s8 + $0xf0] ss:$12 sps:$4 sm:$0xff]  }
 0x134   :  { %684 = vmatprep.subr.bf16.mxu1 %v1452_v21  ;;  %v1506_v21 = vld [vmem:[%s2084_s8 + $0x10c] ss:$12 sps:$4 sm:$0xff]  }
 0x137   :  { %685 = vmatpush1.bf16.msra.mxu1 %v1450_v22  ;;  %v1504_v22 = vld [vmem:[%s2084_s8 + $0x108] ss:$12 sps:$4 sm:$0xff]  }
 0x138   :  { %686 = vmatprep.subr.bf16.mxu1 %v1455_v23  ;;  %v1511_v23 = vld [vmem:[%s2084_s8 + $0x124] ss:$12 sps:$4 sm:$0xff]  }
 0x13b   :  { %687 = vmatpush1.bf16.msra.mxu1 %v1453_v24  ;;  %v1509_v24 = vld [vmem:[%s2084_s8 + $0x120] ss:$12 sps:$4 sm:$0xff]  }
 0x13c   :  { %688 = vmatprep.subr.bf16.mxu1 %v1458_v25  ;;  %v1516_v25 = vld [vmem:[%s2084_s8 + $0x13c] ss:$12 sps:$4 sm:$0xff]  }
 0x13f   :  { %689 = vmatpush1.bf16.msra.mxu1 %v1456_v27  ;;  %v1521_v27 = vld [vmem:[%s2084_s8 + $0x154] ss:$12 sps:$4 sm:$0xff]  }
 0x140   :  { %690 = vmatprep.subr.bf16.mxu1 %v1461_v30  ;;  %v1523_v30 = vld [vmem:[%s2084_s8 + $0x98] ss:$12 sps:$4 sm:$0xff]  }
 0x143   :  { %691 = vmatpush1.bf16.msra.mxu1 %v1459_v35  ;;  %v586_v35 = vld [vmem:[%s2083_s7] sm:$0x3] }
 0x144   :  { %692 = vmatprep.subr.bf16.mxu1 %v1464_v36  ;;  %v591_v36 = vrot.slane %v586_v35, %v1831_v0 }
 0x147   :  { %693 = vmatpush1.bf16.msra.mxu1 %v1462_v37  ;;  %v595_v37 = vrot.slane %v586_v35, %v1837_v2 }
 0x148   :  { %1060 = vmatprep.subr.bf16.mxu1 %v1467_v38 }
 0x1fd   :  { %v1330_v26 = vpop.f32.mrb[0].mxu1 }
 0x1fe   :  { %v1331_v29 = vpop.f32.mrb[1].mxu1 }
 0x1ff   :  { %v1332_v31 = vadd.f32 %v1331_v29, %v1330_v26  ;;  %v1333_v32 = vpop.f32.mrb[2].mxu1  ;;  %v1514_v26 = vld [vmem:[%s2084_s8 + $0x138] ss:$12 sps:$4 sm:$0xff]   ;;  %v1519_v29 = vld [vmem:[%s2084_s8 + $0x150] ss:$12 sps:$4 sm:$0xff]  }
 0x200   :  { %v1334_v33 = vpop.f32.mrb[3].mxu1  ;;  %v1527_v32 = vld [vmem:[%s2084_s8 + $0x170] ss:$12 sps:$4 sm:$0xff]  }
 0x201   :  { %v551_v34 = vadd.f32 %v1332_v31, %v1230_v28  ;;  %v1522_v28 = vld [vmem:[%s2084_s8 + $0x158] ss:$12 sps:$4 sm:$0xff]   ;;  %v1524_v33 = vld [vmem:[%s2084_s8 + $0x168] ss:$12 sps:$4 sm:$0xff]  }
 0x202   :  { %1348 = vmatprep.subr.bf16.mxu0 %v1522_v28  ;;  %v1526_v31 = vld [vmem:[%s2084_s8 + $0x16c] ss:$12 sps:$4 sm:$0xff]  }
 0x203   :  { %556 = vst [vmem:[#allocation4] sm:$0xff] %v551_v34  ;;  %557 = vrot.lane.b32.xlu0 %v551_v34, %s1592_s5  ;;  %1349 = vmatpush3.bf16.msra.mxu0 %v1523_v30 }
 0x204   :  { %1350 = vmatprep.subr.bf16.mxu0 %v1527_v32 }
 0x275   :  { %v558_v52 = vpop.permute.xlu0 %557 }
 0x276   :  { %v562_v53 = vsel %vm561_vm2, %v558_v52, 0.0 }
 0x277   :  { %v564_v54 = vmul.f32 0.5, %v562_v53 }
 0x279   :  { %v565_v55 = vmul.f32 1.442695, %v564_v54 }
 0x27b   :  { %1529 = vpow2.f32 %v565_v55 }
 0x285   :  { %v1530_v57 = vpop.eup %1529 }
 0x286   :  { %v567_v58 = vmul.f32 %v1530_v57, %v563_v56 }
 0x288   :  { %v568_v59 = vadd.f32 %v567_v58, %v551_v34  ;;  %v1528_v34 = vld [vmem:[%s2084_s8 + $0xb0] ss:$12 sps:$4 sm:$0xff]   ;;  %s1593_s8 = smov [#allocation4]  }
 0x289   :  { %1351 = vmatpush3.bf16.msra.mxu0 %v1528_v34  ;;  %s1178_s7 = sshll.u32 %s1593_s8, 4  ;;  %s1179_s7 = int_to_ptr.vmem [resolvable:$true] %s1178_s7 }
 0x28a   :  { %v569_v61 = vpack.c.bf16 %v568_v59, %v568_v59  ;;  %s1543_s5 = scalar_lea.vmem %s1179_s7, 128  ;;  %p1548_p1 = scmp.lt.s32.totalorder %s1179_s7, %s1179_s7 }
 0x28b   :  { %p1544_p0 = scmp.ne.s32.totalorder %s1179_s7, %s1543_s5  ;;  %p1549_p2 = scmp.lt.s32.totalorder %s1543_s5, %s1543_s5 }
 0x28c   :  { %711 = vmatmul.mubr.bf16.vlgmr.msra.gmra.mrb[4].mxu1 %v569_v61 }
 0x28d   :  { %1061 = vmatpush1.bf16.msra.mxu1 %v1465_v60  ;;  %p1550_p3 = por %p1549_p2, %p1548_p1 }
 0x28e   :  { %1062 = vmatprep.subr.bf16.mxu1 %v1470_v62 }
 0x28f   :  { %p1551_p4 = pnand %p1550_p3, %p1544_p0 }
 0x291   :  { %1063 = vmatpush1.bf16.msra.mxu1 %v1468_v1 }
 0x292   :  { %1064 = vmatprep.subr.bf16.mxu1 %v1473_v3 }
 0x295   :  { %1065 = vmatpush1.bf16.msra.mxu1 %v1471_v4 }
 0x296   :  { %1066 = vmatprep.subr.bf16.mxu1 %v1476_v5 }
 0x299   :  { %1067 = vmatpush1.bf16.msra.mxu1 %v1474_v6 }
 0x29a   :  { %1068 = vmatprep.subr.bf16.mxu1 %v1479_v7 }
 0x29d   :  { %1069 = vmatpush1.bf16.msra.mxu1 %v1477_v8 }
 0x29e   :  { %1070 = vmatprep.subr.bf16.mxu1 %v1482_v9 }
 0x2a1   :  { %1071 = vmatpush1.bf16.msra.mxu1 %v1480_v10 }
 0x2a2   :  { %1072 = vmatprep.subr.bf16.mxu1 %v1485_v11 }
 0x2a5   :  { %1073 = vmatpush1.bf16.msra.mxu1 %v1483_v12 }
 0x2a6   :  { %1074 = vmatprep.subr.bf16.mxu1 %v1488_v13 }
 0x2a9   :  { %1075 = vmatpush1.bf16.msra.mxu1 %v1486_v14 }
 0x2aa   :  { %1076 = vmatprep.subr.bf16.mxu1 %v1491_v15 }
 0x2ad   :  { %1077 = vmatpush1.bf16.msra.mxu1 %v1489_v16 }
 0x2ae   :  { %1078 = vmatprep.subr.bf16.mxu1 %v1496_v17 }
 0x2b1   :  { %1079 = vmatpush1.bf16.msra.mxu1 %v1494_v18 }
 0x2b2   :  { %1080 = vmatprep.subr.bf16.mxu1 %v1501_v19 }
 0x2b5   :  { %1081 = vmatpush1.bf16.msra.mxu1 %v1499_v20 }
 0x2b6   :  { %1082 = vmatprep.subr.bf16.mxu1 %v1506_v21 }
 0x2b9   :  { %1083 = vmatpush1.bf16.msra.mxu1 %v1504_v22 }
 0x2ba   :  { %1084 = vmatprep.subr.bf16.mxu1 %v1511_v23 }
 0x2bd   :  { %1085 = vmatpush1.bf16.msra.mxu1 %v1509_v24 }
 0x2be   :  { %1086 = vmatprep.subr.bf16.mxu1 %v1516_v25 }
 0x2c1   :  { %1087 = vmatpush1.bf16.msra.mxu1 %v1514_v26 }
 0x2c2   :  { %1088 = vmatprep.subr.bf16.mxu1 %v1521_v27 }
 0x2c5   :  { %1089 = vmatpush1.bf16.msra.mxu1 %v1519_v29 }
 0x2c6   :  { %1090 = vmatprep.subr.bf16.mxu1 %v1526_v31 }
 0x2c9   :  { %1091 = vmatpush1.bf16.msra.mxu1 %v1524_v33 }
 0x35f   :  { %v712_v38 = vpop.f32.mrb[4].mxu1 }
 0x360   :  { %v713_v39 = vadd.f32 %v712_v38, %v591_v36  ;;  %v714_v40 = vpop.f32.mrb[5].mxu1 }
 0x361   :  { %v715_v41 = vadd.f32 %v714_v40, %v595_v37  ;;  %v716_v42 = vpop.f32.mrb[6].mxu1 }
 0x362   :  { %v719_v43 = vmax.f32 %v713_v39, 0.0  ;;  %v717_v44 = vpop.f32.mrb[7].mxu1 }
 0x363   :  { %v720_v45 = vmax.f32 %v715_v41, 0.0 }
 0x364   :  { %v721_v47 = vpack.c.bf16 %v719_v43, %v719_v43 }
 0x365   :  { %v722_v46 = vpack.c.bf16 %v720_v45, %v720_v45 }
 0x367   :  { %1092 = vmatprep.mubr.bf16.mxu1 %v722_v46  ;;  %1133 = vmatprep.mubr.bf16.mxu0 %v722_v46 }
 0x368   :  { %1093 = vmatmul.mubr.bf16.vlgmr.msra.gmra.mrb[8].mxu1 %v721_v47  ;;  %1134 = vmatmul.mubr.bf16.vlgmr.msra.gmra.mrb[4].mxu0 %v721_v47 }
 0x369   :  { %1554 = shalt.err (!%p1551_p4)
}
 0x36a   :  { %s1555_s26 = scalar_lea.hbm %s2087_s11, 128 }
 0x36b   :  { %p1556_p5 = scmp.ne.s32.totalorder %s2087_s11, %s1555_s26  ;;  %p1559_p6 = scmp.lt.u32.totalorder %s1555_s26, %s2087_s11 }
 0x36d   :  { %p1561_p7 = pnand %p1559_p6, %p1556_p5 }
 0x36f   :  { %1564 = shalt.err (!%p1561_p7)
}
 0x370   :  { %1181 = dma.vmem_to_hbm [thread:$0]  %s1179_s7, 128, %s2087_s11, [#allocation5]   ;;  %v787_v48 = vld [vmem:[%s2085_s9] sm:$0x7]  ;;  %v799_v49 = vsub.s32 2, %v1828_v63 }
 0x371   :  { %v792_v50 = vrot.slane %v787_v48, %v1831_v0  ;;  %v796_v51 = vrot.slane %v787_v48, %v1837_v2  ;;  %s1594_s9 = smov [#allocation2]  }
 0x372   :  { %v800_v54 = vrot.slane %v787_v48, %v799_v49  ;;  %s1168_s11 = sshll.u32 %s1594_s9, 4  ;;  %s1169_s11 = int_to_ptr.vmem [resolvable:$true] %s1168_s11 }
 0x373   :  { %s1565_s1 = scalar_lea.vmem %s1169_s11, 384  ;;  %p1570_p9 = scmp.lt.s32.totalorder %s1169_s11, %s1169_s11 }
 0x374   :  { %p1566_p8 = scmp.ne.s32.totalorder %s1169_s11, %s1565_s1  ;;  %p1571_p10 = scmp.lt.s32.totalorder %s1565_s1, %s1565_s1 }
 0x376   :  { %p1572_p11 = por %p1571_p10, %p1570_p9 }
 0x378   :  { %p1573_p12 = pnand %p1572_p11, %p1566_p8 }
 0x43b   :  { %v1094_v52 = vpop.f32.mrb[8].mxu1  ;;  %v1352_v53 = vpop.f32.mrb[4].mxu0 }
 0x43c   :  { %v1095_v55 = vadd.f32 %v1094_v52, %v792_v50  ;;  %v1096_v56 = vpop.f32.mrb[9].mxu1  ;;  %v1353_v57 = vpop.f32.mrb[5].mxu0 }
 0x43d   :  { %v1097_v58 = vadd.f32 %v1096_v56, %v796_v51  ;;  %v1354_v59 = vadd.f32 %v1353_v57, %v1352_v53  ;;  %v1098_v60 = vpop.f32.mrb[10].mxu1  ;;  %v1355_v61 = vpop.f32.mrb[6].mxu0 }
 0x43e   :  { %v1311_v62 = vmul.f32 -1.442695, %v1095_v55  ;;  %v1099_v1 = vpop.f32.mrb[11].mxu1  ;;  %v1356_v3 = vpop.f32.mrb[7].mxu0 }
 0x43f   :  { %v1312_v4 = vmul.f32 -1.442695, %v1097_v58  ;;  %v1136_v5 = vadd.f32 %v1354_v59, %v800_v54 }
 0x440   :  { %1531 = vpow2.f32 %v1311_v62 }
 0x441   :  { %1533 = vpow2.f32 %v1312_v4  ;;  %v1313_v63 = vmul.f32 -1.442695, %v1136_v5 }
 0x443   :  { %1535 = vpow2.f32 %v1313_v63 }
 0x44a   :  { %v1532_v0 = vpop.eup %1531 }
 0x44b   :  { %v1534_v2 = vpop.eup %1533  ;;  %v1150_v6 = vadd.f32 1.0, %v1532_v0 }
 0x44c   :  { %v1151_v7 = vadd.f32 1.0, %v1534_v2 }
 0x44d   :  { %v1536_v8 = vpop.eup %1535  ;;  %1537 = vrcp.f32 %v1150_v6 }
 0x44e   :  { %1539 = vrcp.f32 %v1151_v7  ;;  %v1152_v9 = vadd.f32 1.0, %v1536_v8 }
 0x450   :  { %1541 = vrcp.f32 %v1152_v9 }
 0x457   :  { %v1538_v10 = vpop.eup %1537 }
 0x458   :  { %v1540_v11 = vpop.eup %1539  ;;  %1159 = vst [vmem:[#allocation2] sm:$0xff] %v1538_v10 }
 0x459   :  { %1160 = vst [vmem:[#allocation2 + $0x8] sm:$0xff] %v1540_v11 }
 0x45a   :  { %v1542_v12 = vpop.eup %1541 }
 0x45b   :  { %1161 = vst.msk [vmem:[#allocation2 + $0x10] sm:$0xff] %vm284_vm1, %v1542_v12 }
 0x45c   :  { %1576 = shalt.err (!%p1573_p12)
}
 0x45d   :  { %s1577_s15 = scalar_lea.hbm %s2086_s10, 384 }
 0x45e   :  { %p1578_p13 = scmp.ne.s32.totalorder %s2086_s10, %s1577_s15  ;;  %p1581_p0 = scmp.lt.u32.totalorder %s1577_s15, %s2086_s10 }
 0x460   :  { %p1583_p1 = pnand %p1581_p0, %p1578_p13 }
 0x462   :  { %1586 = shalt.err (!%p1583_p1)
}
 0x463   :  { %1171 = dma.vmem_to_hbm [thread:$0]  %s1169_s11, 384, %s2086_s10, [#allocation3]  }
 0x464   :  { %1587 = dma.done.wait [#allocation3], 384  }
 0x465   :  { %1588 = vsyncadd [#allocation3], 4294966912 }
 0x466   :  { %1589 = dma.done.wait [#allocation5], 128  }
 0x467   :  { %1590 = vsyncadd [#allocation5], 4294967168 }
 0x468   :  { %1188 = vsyncpa [#allocation3], 1 }
 0x469   :  { %1189 = vsyncpa [#allocation5], 1 }

</bundles_post_ra>
